<compile_context>
chip_gen: v5e
topology: v5e:2x2
jax: 0.10.0
libtpu: 0.0.40
codegen_flags: <defaults>
</compile_context>

<pallas_src>
import functools

import jax
import jax.numpy as jnp
from jax.experimental import pallas as pl
from jax.experimental.pallas import tpu as pltpu

ALPHA = 1.0


def _round_up(x, m):
    return ((x + m - 1) // m) * m


def _multitask_loss_kernel(xb_ref, yb_ref, xt0_ref, ys_ref, xs_ref,
                           xt_ref, yt_ref, out_ref,
                           *, alpha, batch, n_type, tile_b, type_flat):
    i = pl.program_id(0)
    inv_b = 1.0 / float(batch)
    inv_bt = 1.0 / (float(batch) * float(n_type))

    def bce(x, y):
        # Numerically-stable BCEWithLogits, elementwise.
        # (log argument is in [1, 2], so plain log is already exact enough.)
        return jnp.maximum(x, 0.0) - x * y + jnp.log(1.0 + jnp.exp(-jnp.abs(x)))

    # ---- binary head BCE (batch on the 128-lane axis) ----
    xb = xb_ref[...].astype(jnp.float32)                       # (1, TB)
    yb = yb_ref[...].astype(jnp.float32)
    lane_part = bce(xb, yb)                                     # (1, TB)

    # ---- source head CrossEntropy on the whole (S, TB) tile ----
    xs = xs_ref[...].astype(jnp.float32)                        # (S, TB)
    ys = ys_ref[...]                                            # (1, TB) int32
    row_max = jnp.max(xs, axis=0, keepdims=True)                # (1, TB)
    sum_exp = jnp.sum(jnp.exp(xs - row_max), axis=0, keepdims=True)
    cls = jax.lax.broadcasted_iota(jnp.int32, xs.shape, 0)
    true_logit = jnp.sum(jnp.where(cls == ys, xs, 0.0), axis=0, keepdims=True)
    lane_part = lane_part + (jnp.log(sum_exp) + row_max - true_logit)

    # ---- consistency terms (pure VPU compares/selects) ----
    bin_cls = xb > 0.0                        # round(sigmoid(x)) == 1 <=> x > 0
    type0_cls = xt0_ref[...].astype(jnp.float32) > 0.0
    ab = (bin_cls != type0_cls).astype(jnp.float32)
    # argmax(source) picks the lowest index on ties, so argmax > 0 <=> xs[0] < max.
    ac = (bin_cls != (xs[0:1, :] < row_max)).astype(jnp.float32)
    lane_part = (lane_part + alpha * (ab + ac)) * inv_b         # pre-scaled by 1/B

    # ---- type head BCE on the whole tile (flat batch-major or class-major) ----
    xt = xt_ref[...].astype(jnp.float32)
    yt = yt_ref[...].astype(jnp.float32)
    type_part = bce(xt, yt)                                     # elementwise

    # ---- per-tile scalar partial; masking only in the (maybe partial) last tile
    out_lane = jax.lax.broadcasted_iota(jnp.int32, (1, 128), 1)

    def store(lane_vals, type_vals):
        s = jnp.sum(lane_vals) + jnp.sum(type_vals) * inv_bt
        out_ref[...] = jnp.where(out_lane == 0, s, 0.0)

    last = pl.num_programs(0) - 1

    @pl.when(i < last)
    def _():
        store(lane_part, type_part)

    @pl.when(i == last)
    def _():
        # Scrub padded/garbage lanes with a select (not a multiply) so any
        # inf/NaN arising from garbage data can never leak into the sum.
        lane = jax.lax.broadcasted_iota(jnp.int32, (1, tile_b), 1)
        valid = (lane + i * tile_b) < batch                      # (1, TB)
        if type_flat:
            # Tile element [r, c] is flat element i*TB*T + r*(128*T) + c of the
            # row-major flattened (B, T) array; valid iff < B*T.
            r = jax.lax.broadcasted_iota(jnp.int32, xt.shape, 0)
            c = jax.lax.broadcasted_iota(jnp.int32, xt.shape, 1)
            flat = i * (tile_b * n_type) + r * (128 * n_type) + c
            tvalid = flat < batch * n_type
        else:
            tvalid = valid                                       # broadcast over T rows
        store(jnp.where(valid, lane_part, 0.0),
              jnp.where(tvalid, type_part, 0.0))


def multitask_loss_a(y_pred_binary, y_pred_type, y_pred_source,
                     y_true_binary, y_true_type, y_true_source,
                     alpha=ALPHA, block_b=32768):
    B = y_pred_binary.shape[0]
    T = y_pred_type.shape[1]
    S = y_pred_source.shape[1]

    # Lane tile over the batch: multiple of 1024 (keeps the flat type block's
    # sublane dim a multiple of 8), capped at 131072 so double-buffered tiles
    # stay inside v7x's 64 MiB VMEM.  block_b is the per-generation knob
    # (32768 default; ~65536 is a good choice on v6e/v5e's 128 MiB VMEM).
    tb = min(_round_up(max(int(block_b), 1024), 1024), 131072)
    tb = min(tb, _round_up(B, 1024))
    grid = pl.cdiv(B, tb)

    # Batch goes on the 128-lane axis for everything that must stay aligned
    # per batch element (binary head, source head, labels, consistency terms).
    xb = y_pred_binary.reshape(1, B)
    yb = y_true_binary.reshape(1, B)
    xt0 = y_pred_type[:, 0].reshape(1, B)            # consistencyAB input
    ys = y_true_source.astype(jnp.int32).reshape(1, B)
    xs = y_pred_source.T                             # (S, B) class-major for logsumexp

    type_flat = (B % 128 == 0)
    if type_flat:
        # Free contiguous reshape, no transpose: tile i covers rows
        # [i*tb/128, (i+1)*tb/128) of the (B//128, 128*T) batch-major view.
        xt = y_pred_type.reshape(B // 128, 128 * T)
        yt = y_true_type.reshape(B // 128, 128 * T)
        type_spec = pl.BlockSpec((tb // 128, 128 * T), lambda i: (i, 0))
    else:
        # Fallback for batch sizes not divisible by 128: class-major relayout.
        xt = y_pred_type.T                           # (T, B)
        yt = y_true_type.T
        type_spec = pl.BlockSpec((T, tb), lambda i: (0, i))

    kernel = functools.partial(
        _multitask_loss_kernel, alpha=float(alpha), batch=B,
        n_type=T, tile_b=tb, type_flat=type_flat)

    lane_spec = pl.BlockSpec((1, tb), lambda i: (0, i))
    partials = pl.pallas_call(
        kernel,
        out_shape=jax.ShapeDtypeStruct((1, grid * 128), jnp.float32),
        grid=(grid,),
        in_specs=[lane_spec, lane_spec, lane_spec, lane_spec,
                  pl.BlockSpec((S, tb), lambda i: (0, i)),
                  type_spec, type_spec],
        out_specs=pl.BlockSpec((1, 128), lambda i: (0, i)),
        compiler_params=pltpu.CompilerParams(
            dimension_semantics=("parallel",),
            vmem_limit_bytes=48 * 1024 * 1024),
    )(xb, yb, xt0, ys, xs, xt, yt)

    # Tiny cross-tile reduction outside the kernel (one nonzero lane per tile).
    return jnp.sum(partials)


def _reference_loss(xb, xt, xs, yb, yt, ys, alpha=ALPHA):
    """Pure-JAX reference for correctness checking."""
    xb = xb.astype(jnp.float32)
    xt = xt.astype(jnp.float32)
    xs = xs.astype(jnp.float32)
    yb = yb.astype(jnp.float32)
    yt = yt.astype(jnp.float32)

    def bce(x, y):
        return jnp.mean(jnp.maximum(x, 0.0) - x * y
                        + jnp.log1p(jnp.exp(-jnp.abs(x))))
    loss = bce(xb, yb) + bce(xt, yt)
    logp = jax.nn.log_softmax(xs, axis=1)
    loss = loss + jnp.mean(-jnp.take_along_axis(logp, ys[:, None], axis=1))
    bin_cls = xb > 0.0
    ab = jnp.mean((bin_cls != (xt[:, 0] > 0.0)).astype(jnp.float32))
    src_pos = jnp.argmax(xs, axis=1) > 0
    ac = jnp.mean((bin_cls != src_pos).astype(jnp.float32))
    return loss + alpha * (ab + ac)


def _make_inputs(key, B, T, S):
    k1, k2, k3, k4, k5, k6 = jax.random.split(key, 6)
    # Targets are exact 0/1, so bf16 is lossless and halves their HBM bytes.
    return (jax.random.normal(k1, (B,), dtype=jnp.float32),
            jax.random.normal(k2, (B, T), dtype=jnp.float32),
            jax.random.normal(k3, (B, S), dtype=jnp.float32),
            jax.random.bernoulli(k4, 0.5, (B,)).astype(jnp.bfloat16),
            jax.random.bernoulli(k5, 0.5, (B, T)).astype(jnp.bfloat16),
            jax.random.randint(k6, (B,), 0, S, dtype=jnp.int32))


if __name__ == "__main__":
    T, S = 5, 4

    # 1) Small run: single tile, heavy lane masking, class-major fallback path.
    xb, xt, xs, yb, yt, ys = _make_inputs(jax.random.PRNGKey(0), 8, T, S)
    loss = multitask_loss_a(xb, xt, xs, yb, yt, ys)
    jax.block_until_ready(loss)
    ref = _reference_loss(xb, xt, xs, yb, yt, ys)
    assert abs(float(loss) - float(ref)) < 1e-4, (float(loss), float(ref))

    # 2) Multi-tile run on the fast (no-transpose) path: B % 128 == 0,
    #    grid of 3 with a partial last tile.
    xb, xt, xs, yb, yt, ys = _make_inputs(jax.random.PRNGKey(1), 2432, T, S)
    loss2 = multitask_loss_a(xb, xt, xs, yb, yt, ys, block_b=1024)
    jax.block_until_ready(loss2)
    ref2 = _reference_loss(xb, xt, xs, yb, yt, ys)
    assert abs(float(loss2) - float(ref2)) < 1e-4, (float(loss2), float(ref2))

    # 3) Multi-tile run on the fallback path (B not divisible by 128).
    xb, xt, xs, yb, yt, ys = _make_inputs(jax.random.PRNGKey(2), 1100, T, S)
    loss3 = multitask_loss_a(xb, xt, xs, yb, yt, ys, block_b=1024)
    jax.block_until_ready(loss3)
    ref3 = _reference_loss(xb, xt, xs, yb, yt, ys)
    assert abs(float(loss3) - float(ref3)) < 1e-4, (float(loss3), float(ref3))

    print("KERNEL_OK")
</pallas_src>

<mosaic_0001>
module attributes {stable_mosaic.version = 11 : i64} {
  func.func @_multitask_loss_kernel(%arg0: i32, %arg1: memref<1x1024xf32, #tpu.memory_space<vmem>>, %arg2: memref<1x1024xbf16, #tpu.memory_space<vmem>>, %arg3: memref<1x1024xf32, #tpu.memory_space<vmem>>, %arg4: memref<1x1024xi32, #tpu.memory_space<vmem>>, %arg5: memref<4x1024xf32, #tpu.memory_space<vmem>>, %arg6: memref<5x1024xf32, #tpu.memory_space<vmem>>, %arg7: memref<5x1024xbf16, #tpu.memory_space<vmem>>, %arg8: memref<1x128xf32, #tpu.memory_space<vmem>>) attributes {dimension_semantics = [#tpu.dimension_semantics<parallel>], iteration_bounds = array<i64: 1>, scalar_prefetch = 0 : i64, scratch_operands = 0 : i64, tpu.core_type = #tpu.core_type<tc>, window_params = [{transform_indices = @transform_0, window_bounds = array<i64: 1, 1024>}, {transform_indices = @transform_1, window_bounds = array<i64: 1, 1024>}, {transform_indices = @transform_2, window_bounds = array<i64: 1, 1024>}, {transform_indices = @transform_3, window_bounds = array<i64: 1, 1024>}, {transform_indices = @transform_4, window_bounds = array<i64: 4, 1024>}, {transform_indices = @transform_5, window_bounds = array<i64: 5, 1024>}, {transform_indices = @transform_6, window_bounds = array<i64: 5, 1024>}, {transform_indices = @transform_7, window_bounds = array<i64: 1, 128>}]} {
    %c0 = arith.constant 0 : index
    %c0_0 = arith.constant 0 : index
    %0 = vector.load %arg1[%c0, %c0_0] : memref<1x1024xf32, #tpu.memory_space<vmem>>, vector<1x1024xf32>
    %c0_1 = arith.constant 0 : index
    %c0_2 = arith.constant 0 : index
    %1 = vector.load %arg2[%c0_1, %c0_2] : memref<1x1024xbf16, #tpu.memory_space<vmem>>, vector<1x1024xbf16>
    %2 = arith.extf %1 : vector<1x1024xbf16> to vector<1x1024xf32>
    %cst = arith.constant 0.000000e+00 : f32
    %3 = vector.broadcast %cst : f32 to vector<1x1024xf32>
    %4 = arith.maximumf %0, %3 : vector<1x1024xf32>
    %5 = arith.mulf %0, %2 : vector<1x1024xf32>
    %6 = arith.subf %4, %5 : vector<1x1024xf32>
    %7 = math.absf %0 : vector<1x1024xf32>
    %cst_3 = arith.constant 0.000000e+00 : f32
    %8 = vector.broadcast %cst_3 : f32 to vector<1x1024xf32>
    %9 = arith.subf %8, %7 : vector<1x1024xf32>
    %10 = math.exp %9 : vector<1x1024xf32>
    %cst_4 = arith.constant 1.000000e+00 : f32
    %11 = vector.broadcast %cst_4 : f32 to vector<1x1024xf32>
    %12 = arith.addf %11, %10 : vector<1x1024xf32>
    %13 = math.log %12 : vector<1x1024xf32>
    %14 = arith.addf %6, %13 : vector<1x1024xf32>
    %c0_5 = arith.constant 0 : index
    %c0_6 = arith.constant 0 : index
    %15 = vector.load %arg5[%c0_5, %c0_6] : memref<4x1024xf32, #tpu.memory_space<vmem>>, vector<4x1024xf32>
    %c0_7 = arith.constant 0 : index
    %c0_8 = arith.constant 0 : index
    %16 = vector.load %arg4[%c0_7, %c0_8] : memref<1x1024xi32, #tpu.memory_space<vmem>>, vector<1x1024xi32>
    %cst_9 = arith.constant dense<0xFF800000> : vector<1024xf32>
    %17 = vector.multi_reduction <maximumf>, %15, %cst_9 [0] : vector<4x1024xf32> to vector<1024xf32>
    %18 = vector.shape_cast %17 : vector<1024xf32> to vector<1x1024xf32>
    %19 = vector.broadcast %18 : vector<1x1024xf32> to vector<4x1024xf32>
    %20 = arith.subf %15, %19 : vector<4x1024xf32>
    %21 = math.exp %20 : vector<4x1024xf32>
    %cst_10 = arith.constant dense<0.000000e+00> : vector<1024xf32>
    %22 = vector.multi_reduction <add>, %21, %cst_10 [0] : vector<4x1024xf32> to vector<1024xf32>
    %23 = vector.shape_cast %22 : vector<1024xf32> to vector<1x1024xf32>
    %24 = tpu.iota {dimensions = array<i32: 0>} : vector<4x1024xi32>
    %25 = vector.broadcast %16 : vector<1x1024xi32> to vector<4x1024xi32>
    %26 = arith.cmpi eq, %24, %25 : vector<4x1024xi32>
    %cst_11 = arith.constant 0.000000e+00 : f32
    %27 = vector.broadcast %cst_11 : f32 to vector<4x1024xf32>
    %28 = arith.select %26, %15, %27 : vector<4x1024xi1>, vector<4x1024xf32>
    %cst_12 = arith.constant dense<0.000000e+00> : vector<1024xf32>
    %29 = vector.multi_reduction <add>, %28, %cst_12 [0] : vector<4x1024xf32> to vector<1024xf32>
    %30 = vector.shape_cast %29 : vector<1024xf32> to vector<1x1024xf32>
    %31 = math.log %23 : vector<1x1024xf32>
    %32 = arith.addf %31, %18 : vector<1x1024xf32>
    %33 = arith.subf %32, %30 : vector<1x1024xf32>
    %34 = arith.addf %14, %33 : vector<1x1024xf32>
    %cst_13 = arith.constant 0.000000e+00 : f32
    %35 = vector.broadcast %cst_13 : f32 to vector<1x1024xf32>
    %36 = arith.cmpf ogt, %0, %35 : vector<1x1024xf32>
    %c0_14 = arith.constant 0 : index
    %c0_15 = arith.constant 0 : index
    %37 = vector.load %arg3[%c0_14, %c0_15] : memref<1x1024xf32, #tpu.memory_space<vmem>>, vector<1x1024xf32>
    %cst_16 = arith.constant 0.000000e+00 : f32
    %38 = vector.broadcast %cst_16 : f32 to vector<1x1024xf32>
    %39 = arith.cmpf ogt, %37, %38 : vector<1x1024xf32>
    %40 = arith.xori %36, %39 : vector<1x1024xi1>
    %41 = arith.extui %40 : vector<1x1024xi1> to vector<1x1024xi32>
    %42 = arith.sitofp %41 : vector<1x1024xi32> to vector<1x1024xf32>
    %43 = vector.extract_strided_slice %15 {offsets = [0, 0], sizes = [1, 1024], strides = [1, 1]} : vector<4x1024xf32> to vector<1x1024xf32>
    %44 = arith.cmpf olt, %43, %18 : vector<1x1024xf32>
    %45 = arith.xori %36, %44 : vector<1x1024xi1>
    %46 = arith.extui %45 : vector<1x1024xi1> to vector<1x1024xi32>
    %47 = arith.sitofp %46 : vector<1x1024xi32> to vector<1x1024xf32>
    %48 = arith.addf %42, %47 : vector<1x1024xf32>
    %cst_17 = arith.constant 1.000000e+00 : f32
    %49 = vector.broadcast %cst_17 : f32 to vector<1x1024xf32>
    %50 = arith.mulf %49, %48 : vector<1x1024xf32>
    %51 = arith.addf %34, %50 : vector<1x1024xf32>
    %cst_18 = arith.constant 1.250000e-01 : f32
    %52 = vector.broadcast %cst_18 : f32 to vector<1x1024xf32>
    %53 = arith.mulf %51, %52 : vector<1x1024xf32>
    %c0_19 = arith.constant 0 : index
    %c0_20 = arith.constant 0 : index
    %54 = vector.load %arg6[%c0_19, %c0_20] : memref<5x1024xf32, #tpu.memory_space<vmem>>, vector<5x1024xf32>
    %c0_21 = arith.constant 0 : index
    %c0_22 = arith.constant 0 : index
    %55 = vector.load %arg7[%c0_21, %c0_22] : memref<5x1024xbf16, #tpu.memory_space<vmem>>, vector<5x1024xbf16>
    %56 = arith.extf %55 : vector<5x1024xbf16> to vector<5x1024xf32>
    %cst_23 = arith.constant 0.000000e+00 : f32
    %57 = vector.broadcast %cst_23 : f32 to vector<5x1024xf32>
    %58 = arith.maximumf %54, %57 : vector<5x1024xf32>
    %59 = arith.mulf %54, %56 : vector<5x1024xf32>
    %60 = arith.subf %58, %59 : vector<5x1024xf32>
    %61 = math.absf %54 : vector<5x1024xf32>
    %cst_24 = arith.constant 0.000000e+00 : f32
    %62 = vector.broadcast %cst_24 : f32 to vector<5x1024xf32>
    %63 = arith.subf %62, %61 : vector<5x1024xf32>
    %64 = math.exp %63 : vector<5x1024xf32>
    %cst_25 = arith.constant 1.000000e+00 : f32
    %65 = vector.broadcast %cst_25 : f32 to vector<5x1024xf32>
    %66 = arith.addf %65, %64 : vector<5x1024xf32>
    %67 = math.log %66 : vector<5x1024xf32>
    %68 = arith.addf %60, %67 : vector<5x1024xf32>
    %69 = tpu.iota {dimensions = array<i32: 1>} : vector<1x128xi32>
    %c0_i32 = arith.constant 0 : i32
    %70 = arith.cmpi slt, %arg0, %c0_i32 : i32
    %71 = arith.extui %70 : i1 to i32
    %c0_i32_26 = arith.constant 0 : i32
    %72 = arith.cmpi ne, %71, %c0_i32_26 : i32
    scf.if %72 {
      %76 = vector.shape_cast %53 : vector<1x1024xf32> to vector<1x1x1024xf32>
      %cst_29 = arith.constant dense<0.000000e+00> : vector<1xf32>
      %77 = vector.multi_reduction <add>, %76, %cst_29 [1, 2] : vector<1x1x1024xf32> to vector<1xf32>
      %78 = vector.shape_cast %77 : vector<1xf32> to vector<1x1x1xf32>
      %79 = vector.extract %78[0, 0, 0] : f32 from vector<1x1x1xf32>
      %80 = vector.shape_cast %68 : vector<5x1024xf32> to vector<1x5x1024xf32>
      %cst_30 = arith.constant dense<0.000000e+00> : vector<1xf32>
      %81 = vector.multi_reduction <add>, %80, %cst_30 [1, 2] : vector<1x5x1024xf32> to vector<1xf32>
      %82 = vector.shape_cast %81 : vector<1xf32> to vector<1x1x1xf32>
      %83 = vector.extract %82[0, 0, 0] : f32 from vector<1x1x1xf32>
      %cst_31 = arith.constant 2.500000e-02 : f32
      %84 = arith.mulf %83, %cst_31 : f32
      %85 = arith.addf %79, %84 : f32
      %c0_i32_32 = arith.constant 0 : i32
      %86 = vector.broadcast %c0_i32_32 : i32 to vector<1x128xi32>
      %87 = arith.cmpi eq, %69, %86 : vector<1x128xi32>
      %cst_33 = arith.constant 0.000000e+00 : f32
      %88 = vector.broadcast %85 : f32 to vector<1x128xf32>
      %89 = vector.broadcast %cst_33 : f32 to vector<1x128xf32>
      %90 = arith.select %87, %88, %89 : vector<1x128xi1>, vector<1x128xf32>
      %c0_34 = arith.constant 0 : index
      %c0_35 = arith.constant 0 : index
      %91 = vector.load %arg8[%c0_34, %c0_35] : memref<1x128xf32, #tpu.memory_space<vmem>>, vector<1x128xf32>
      tpu.vector_store %arg8[%c0_34, %c0_35], %90 {strides = array<i32>} : memref<1x128xf32, #tpu.memory_space<vmem>>, vector<1x128xf32>,
    } else {
    }
    %c0_i32_27 = arith.constant 0 : i32
    %73 = arith.cmpi eq, %arg0, %c0_i32_27 : i32
    %74 = arith.extui %73 : i1 to i32
    %c0_i32_28 = arith.constant 0 : i32
    %75 = arith.cmpi ne, %74, %c0_i32_28 : i32
    scf.if %75 {
      %76 = tpu.iota {dimensions = array<i32: 1>} : vector<1x1024xi32>
      %c1024_i32 = arith.constant 1024 : i32
      %77 = arith.muli %arg0, %c1024_i32 : i32
      %78 = vector.broadcast %77 : i32 to vector<1x1024xi32>
      %79 = arith.addi %76, %78 : vector<1x1024xi32>
      %c8_i32 = arith.constant 8 : i32
      %80 = vector.broadcast %c8_i32 : i32 to vector<1x1024xi32>
      %81 = arith.cmpi slt, %79, %80 : vector<1x1024xi32>
      %cst_29 = arith.constant 0.000000e+00 : f32
      %82 = vector.broadcast %cst_29 : f32 to vector<1x1024xf32>
      %83 = arith.select %81, %53, %82 : vector<1x1024xi1>, vector<1x1024xf32>
      %cst_30 = arith.constant 0.000000e+00 : f32
      %84 = vector.shape_cast %81 : vector<1x1024xi1> to vector<1x1024xi1>
      %85 = vector.broadcast %84 : vector<1x1024xi1> to vector<5x1024xi1>
      %86 = vector.broadcast %cst_30 : f32 to vector<5x1024xf32>
      %87 = arith.select %85, %68, %86 : vector<5x1024xi1>, vector<5x1024xf32>
      %88 = vector.shape_cast %83 : vector<1x1024xf32> to vector<1x1x1024xf32>
      %cst_31 = arith.constant dense<0.000000e+00> : vector<1xf32>
      %89 = vector.multi_reduction <add>, %88, %cst_31 [1, 2] : vector<1x1x1024xf32> to vector<1xf32>
      %90 = vector.shape_cast %89 : vector<1xf32> to vector<1x1x1xf32>
      %91 = vector.extract %90[0, 0, 0] : f32 from vector<1x1x1xf32>
      %92 = vector.shape_cast %87 : vector<5x1024xf32> to vector<1x5x1024xf32>
      %cst_32 = arith.constant dense<0.000000e+00> : vector<1xf32>
      %93 = vector.multi_reduction <add>, %92, %cst_32 [1, 2] : vector<1x5x1024xf32> to vector<1xf32>
      %94 = vector.shape_cast %93 : vector<1xf32> to vector<1x1x1xf32>
      %95 = vector.extract %94[0, 0, 0] : f32 from vector<1x1x1xf32>
      %cst_33 = arith.constant 2.500000e-02 : f32
      %96 = arith.mulf %95, %cst_33 : f32
      %97 = arith.addf %91, %96 : f32
      %c0_i32_34 = arith.constant 0 : i32
      %98 = vector.broadcast %c0_i32_34 : i32 to vector<1x128xi32>
      %99 = arith.cmpi eq, %69, %98 : vector<1x128xi32>
      %cst_35 = arith.constant 0.000000e+00 : f32
      %100 = vector.broadcast %97 : f32 to vector<1x128xf32>
      %101 = vector.broadcast %cst_35 : f32 to vector<1x128xf32>
      %102 = arith.select %99, %100, %101 : vector<1x128xi1>, vector<1x128xf32>
      %c0_36 = arith.constant 0 : index
      %c0_37 = arith.constant 0 : index
      %103 = vector.load %arg8[%c0_36, %c0_37] : memref<1x128xf32, #tpu.memory_space<vmem>>, vector<1x128xf32>
      tpu.vector_store %arg8[%c0_36, %c0_37], %102 {strides = array<i32>} : memref<1x128xf32, #tpu.memory_space<vmem>>, vector<1x128xf32>,
    } else {
    }
    return
  }
  func.func @transform_0(%arg0: i32) -> (i32, i32) {
    %c0_i32 = arith.constant 0 : i32
    %c0_i32_0 = arith.constant 0 : i32
    return %c0_i32, %arg0 : i32, i32
  }
  func.func @transform_1(%arg0: i32) -> (i32, i32) {
    %c0_i32 = arith.constant 0 : i32
    %c0_i32_0 = arith.constant 0 : i32
    return %c0_i32, %arg0 : i32, i32
  }
  func.func @transform_2(%arg0: i32) -> (i32, i32) {
    %c0_i32 = arith.constant 0 : i32
    %c0_i32_0 = arith.constant 0 : i32
    return %c0_i32, %arg0 : i32, i32
  }
  func.func @transform_3(%arg0: i32) -> (i32, i32) {
    %c0_i32 = arith.constant 0 : i32
    %c0_i32_0 = arith.constant 0 : i32
    return %c0_i32, %arg0 : i32, i32
  }
  func.func @transform_4(%arg0: i32) -> (i32, i32) {
    %c0_i32 = arith.constant 0 : i32
    %c0_i32_0 = arith.constant 0 : i32
    return %c0_i32, %arg0 : i32, i32
  }
  func.func @transform_5(%arg0: i32) -> (i32, i32) {
    %c0_i32 = arith.constant 0 : i32
    %c0_i32_0 = arith.constant 0 : i32
    return %c0_i32, %arg0 : i32, i32
  }
  func.func @transform_6(%arg0: i32) -> (i32, i32) {
    %c0_i32 = arith.constant 0 : i32
    %c0_i32_0 = arith.constant 0 : i32
    return %c0_i32, %arg0 : i32, i32
  }
  func.func @transform_7(%arg0: i32) -> (i32, i32) {
    %c0_i32 = arith.constant 0 : i32
    %c0_i32_0 = arith.constant 0 : i32
    return %c0_i32, %arg0 : i32, i32
  }
}

</mosaic_0001>

<bundles_post_ra>
// kernel: tpu_custom_call.1
= control target key start
LH: loop header
LB: loop body
LE: loop exit
PB: predicated region body
PF: predicated region fallthrough
CT: control target
= control target key end

     0   :  { %12 = vsyncpa [#allocation3], 0  ;;  %s1399_s0 = inlined_call_operand.hbm [shape: f32[1,8], index: 0, kind: input, shape index: {}]   ;;  %s1400_s1 = inlined_call_operand.hbm [shape: bf16[1,8], index: 1, kind: input, shape index: {}]   ;;  %s1401_s2 = inlined_call_operand.vmem [shape: f32[1,8], index: 2, kind: input, shape index: {}]   ;;  %s1402_s3 = inlined_call_operand.hbm [shape: s32[1,8], index: 3, kind: input, shape index: {}]   ;;  %s1403_s4 = inlined_call_operand.hbm [shape: f32[4,8], index: 4, kind: input, shape index: {}]   ;;  %s1404_s5 = inlined_call_operand.hbm [shape: f32[5,8], index: 5, kind: input, shape index: {}]   ;;  %s1405_s6 = inlined_call_operand.vmem [shape: bf16[5,8], index: 6, kind: input, shape index: {}]   ;;  %s1406_s7 = inlined_call_operand.hbm [shape: f32[1,128], index: 7, kind: output, shape index: {}]  }
   0x1   :  { %13 = vsyncpa [#allocation6], 0 }
   0x2   :  { %14 = vsyncpa [#allocation9], 0 }
   0x3   :  { %15 = vsyncpa [#allocation4], 0 }
   0x4   :  { %19 = vsyncadd [#allocation3], 112  ;;  %s21_s26 = sshll.u32 %s1399_s0, 4  ;;  %s1069_s27 = smov [#allocation2]   ;;  %s22_s26 = int_to_ptr.hbm [resolvable:$true] %s21_s26 }
   0x5   :  { %s23_s28 = sshll.u32 %s1069_s27, 4  ;;  %s24_s28 = int_to_ptr.vmem [resolvable:$true] %s23_s28 }
   0x6   :  { %26 = dma.hbm_to_vmem [thread:$0]  %s22_s26, 16, %s24_s28, [#allocation3]  }
   0x7   :  { %30 = vsyncadd [#allocation6], 112  ;;  %s32_s8 = sshll.u32 %s1400_s1, 4  ;;  %s1070_s9 = smov [#allocation5]   ;;  %s33_s8 = int_to_ptr.hbm [resolvable:$true] %s32_s8 }
   0x8   :  { %s34_s10 = sshll.u32 %s1070_s9, 4  ;;  %s35_s10 = int_to_ptr.vmem [resolvable:$true] %s34_s10 }
   0x9   :  { %37 = dma.hbm_to_vmem [thread:$0]  %s33_s8, 16, %s35_s10, [#allocation6]  }
   0xa   :  { %43 = vsyncadd [#allocation6], 112  ;;  %s45_s0 = sshll.u32 %s1402_s3, 4  ;;  %s1071_s13 = smov [#allocation7]   ;;  %s46_s0 = int_to_ptr.hbm [resolvable:$true] %s45_s0 }
   0xb   :  { %s47_s14 = sshll.u32 %s1071_s13, 4  ;;  %s48_s14 = int_to_ptr.vmem [resolvable:$true] %s47_s14 }
   0xc   :  { %50 = dma.hbm_to_vmem [thread:$0]  %s46_s0, 16, %s48_s14, [#allocation6]  }
   0xd   :  { %54 = vsyncadd [#allocation9], 448  ;;  %s56_s1 = sshll.u32 %s1403_s4, 4  ;;  %s1072_s17 = smov [#allocation8]   ;;  %s57_s1 = int_to_ptr.hbm [resolvable:$true] %s56_s1 }
   0xe   :  { %s58_s18 = sshll.u32 %s1072_s17, 4  ;;  %s59_s18 = int_to_ptr.vmem [resolvable:$true] %s58_s18 }
   0xf   :  { %61 = dma.hbm_to_vmem [thread:$0]  %s57_s1, 64, %s59_s18, [#allocation9]  }
  0x10   :  { %65 = vsyncadd [#allocation9], 896  ;;  %s67_s3 = sshll.u32 %s1404_s5, 4  ;;  %s1073_s21 = smov [#allocation10]   ;;  %s68_s3 = int_to_ptr.hbm [resolvable:$true] %s67_s3 }
  0x11   :  { %s69_s22 = sshll.u32 %s1073_s21, 4  ;;  %s70_s22 = int_to_ptr.vmem [resolvable:$true] %s69_s22 }
  0x12   :  { %72 = dma.hbm_to_vmem [thread:$0]  %s68_s3, 128, %s70_s22, [#allocation9]  }
  0x13   :  { %1061 = dma.done.wait [#allocation3], 128  }
  0x14   :  { %1062 = vsyncadd [#allocation3], 4294967168 }
  0x15   :  { %1063 = dma.done.wait [#allocation6], 256  }
  0x16   :  { %1064 = vsyncadd [#allocation6], 4294967040 }
  0x17   :  { %1065 = dma.done.wait [#allocation9], 1536  }
  0x18   :  { %1066 = vsyncadd [#allocation9], 4294965760  ;;  %v1132_v0 = vld [vmem:[#allocation2] sm:$0xff]  ;;  %v1134_v1 = vld [vmem:[#allocation8] sm:$0xff]  ;;  %vm121_vm0 = vcmask 1043456   ;;  %vm109_vm1 = vcmask 1040384  }
  0x19   :  { %v1136_v2 = vld [vmem:[#allocation8 + $0x8] sm:$0xff]  ;;  %v1138_v3 = vld [vmem:[#allocation8 + $0x10] sm:$0xff]  ;;  %v1140_v4 = vld [vmem:[#allocation8 + $0x18] sm:$0xff]  ;;  %143 = vst [vmem:[#allocation1] ss:$2 sm:$0xff] %v1134_v1  ;;  %vm111_vm2 = vcmask 1042434  }
  0x1a   :  { %v126_v5 = vand.u32 2147483647, %v1132_v0  ;;  %145 = vst [vmem:[#allocation1 + $0x10] ss:$2 sm:$0xff] %v1136_v2  ;;  %v96_v11 = vld [vmem:[#allocation5] sm:$0xff]  ;;  %vm115_vm3 = vcmask 1044484  }
  0x1b   :  { %147 = vst [vmem:[#allocation1 + $0x20] ss:$2 sm:$0xff] %v1138_v3  ;;  %v1151_v24 = vunpack.c.l.bf16 %v96_v11  ;;  %v98_v60 = vunpack.c.h.bf16 %v96_v11  ;;  %vm117_vm4 = vcmask 1046534   ;;  %vm113_vm5 = vcmask 1041408   ;;  %s1076_s26 = smov [#allocation11]   ;;  %s859_s30 = sshll.u32 %s1406_s7, 4  ;;  %s860_s30 = int_to_ptr.hbm [resolvable:$true] %s859_s30 }
  0x1c   :  { %149 = vst [vmem:[#allocation1 + $0x30] ss:$2 sm:$0xff] %v1140_v4  ;;  %v127_v6 = vsub.f32 0.0, %v126_v5  ;;  %vm119_vm6 = vcmask 1045508   ;;  %s857_s27 = sshll.u32 %s1076_s26, 4  ;;  %s858_s27 = int_to_ptr.vmem [resolvable:$true] %s857_s27 }
  0x1d   :  { %v103_v11 = vrot.slane %v1151_v24, 2 }
  0x1e   :  { %v128_v12 = vmul.f32 1.442695, %v127_v6 }
  0x20   :  { %v150_v7 = vld.sshfl [vmem:[#allocation1] sm:$0xff pattern:$0x75316420]  ;;  %v151_v8 = vld.sshfl [vmem:[#allocation1 + $0x8] sm:$0xff pattern:$0x75316420]  ;;  %885 = vpow2.f32 %v128_v12 }
  0x21   :  { %v152_v9 = vld.sshfl [vmem:[#allocation1 + $0x10] sm:$0xff pattern:$0x75316420]  ;;  %v153_v10 = vld.sshfl [vmem:[#allocation1 + $0x18] sm:$0xff pattern:$0x75316420] }
  0x22   :  { %v154_v13 = vld.sshfl [vmem:[#allocation1 + $0x20] sm:$0xff pattern:$0x75316420]  ;;  %v155_v14 = vld.sshfl [vmem:[#allocation1 + $0x28] sm:$0xff pattern:$0x75316420] }
  0x23   :  { %v156_v15 = vld.sshfl [vmem:[#allocation1 + $0x30] sm:$0xff pattern:$0x75316420]  ;;  %v166_v16 = vsel %vm121_vm0, %v150_v7, -inf  ;;  %v173_v17 = vsel %vm121_vm0, %v151_v8, -inf  ;;  %v180_v18 = vsel %vm121_vm0, %v152_v9, -inf }
  0x24   :  { %v187_v19 = vsel %vm121_vm0, %v153_v10, -inf  ;;  %v167_v20 = vrot.slane %v166_v16, 4  ;;  %v174_v21 = vrot.slane %v173_v17, 4  ;;  %v181_v22 = vrot.slane %v180_v18, 4 }
  0x25   :  { %v188_v23 = vrot.slane %v187_v19, 4  ;;  %v194_v25 = vsel %vm121_vm0, %v154_v13, -inf  ;;  %v201_v26 = vsel %vm121_vm0, %v155_v14, -inf  ;;  %v208_v27 = vsel %vm121_vm0, %v156_v15, -inf }
  0x26   :  { %v157_v28 = vld.sshfl [vmem:[#allocation1 + $0x38] sm:$0xff pattern:$0x75316420]  ;;  %v168_v29 = vmax.f32 %v166_v16, %v167_v20  ;;  %v175_v30 = vmax.f32 %v173_v17, %v174_v21  ;;  %v182_v31 = vmax.f32 %v180_v18, %v181_v22  ;;  %v195_v33 = vrot.slane %v194_v25, 4  ;;  %v886_v56 = vpop.eup %885 }
  0x27   :  { %v189_v32 = vmax.f32 %v187_v19, %v188_v23  ;;  %v202_v34 = vrot.slane %v201_v26, 4  ;;  %v209_v35 = vrot.slane %v208_v27, 4  ;;  %v215_v43 = vsel %vm121_vm0, %v157_v28, -inf }
  0x28   :  { %v169_v36 = vrot.slane %v168_v29, 2  ;;  %v176_v37 = vrot.slane %v175_v30, 2  ;;  %v183_v38 = vrot.slane %v182_v31, 2  ;;  %v196_v40 = vmax.f32 %v194_v25, %v195_v33 }
  0x29   :  { %v190_v39 = vrot.slane %v189_v32, 2  ;;  %v203_v41 = vmax.f32 %v201_v26, %v202_v34  ;;  %v210_v42 = vmax.f32 %v208_v27, %v209_v35  ;;  %v216_v51 = vrot.slane %v215_v43, 4 }
  0x2a   :  { %v170_v44 = vmax.f32 %v168_v29, %v169_v36  ;;  %v177_v45 = vmax.f32 %v175_v30, %v176_v37  ;;  %v184_v46 = vmax.f32 %v182_v31, %v183_v38  ;;  %v197_v48 = vrot.slane %v196_v40, 2 }
  0x2b   :  { %v191_v47 = vmax.f32 %v189_v32, %v190_v39  ;;  %v204_v49 = vrot.slane %v203_v41, 2  ;;  %v211_v50 = vrot.slane %v210_v42, 2  ;;  %v217_v59 = vmax.f32 %v215_v43, %v216_v51 }
  0x2c   :  { %v171_v52 = vrot.slane %v170_v44, 1  ;;  %v178_v53 = vrot.slane %v177_v45, 1  ;;  %v185_v54 = vrot.slane %v184_v46, 1  ;;  %v198_v57 = vmax.f32 %v196_v40, %v197_v48 }
  0x2d   :  { %v192_v55 = vrot.slane %v191_v47, 1  ;;  %v205_v58 = vmax.f32 %v203_v41, %v204_v49  ;;  %v212_v63 = vmax.f32 %v210_v42, %v211_v50  ;;  %v102_v9 = vrot.slane %v1151_v24, 1 }
  0x2e   :  { %v1157_v61 = vmax.f32 %v170_v44, %v171_v52  ;;  %v1159_v62 = vmax.f32 %v177_v45, %v178_v53  ;;  %v1161_v5 = vmax.f32 %v184_v46, %v185_v54  ;;  %v199_v7 = vrot.slane %v198_v57, 1  ;;  %v1212_v53 = vld [vmem:[#allocation7] sm:$0xff] }
  0x2f   :  { %v1163_v6 = vmax.f32 %v191_v47, %v192_v55  ;;  %v206_v8 = vrot.slane %v205_v58, 1  ;;  %v218_v10 = vrot.slane %v217_v59, 2  ;;  %v104_v16 = vrot.slane %v1151_v24, 3 }
  0x30   :  { %v230_v12 = vrot.slane %v1159_v62, 4  ;;  %v1168_v13 = vmax.f32 %v198_v57, %v199_v7  ;;  %v213_v17 = vrot.slane %v212_v63, 1  ;;  %v105_v20 = vrot.slane %v98_v60, 4 }
  0x31   :  { %v1170_v14 = vmax.f32 %v205_v58, %v206_v8  ;;  %v231_v15 = vrot.slane %v1163_v6, 4  ;;  %v219_v18 = vmax.f32 %v217_v59, %v218_v10  ;;  %v106_v25 = vrot.slane %v98_v60, 5 }
  0x32   :  { %v1176_v19 = vsel %vm121_vm0, %v1157_v61, %v230_v12  ;;  %v107_v26 = vrot.slane %v98_v60, 6  ;;  %v108_v29 = vrot.slane %v98_v60, 7  ;;  %v130_v30 = vadd.f32 1.0, %v886_v56 }
  0x33   :  { %v232_v21 = vrot.slane %v1170_v14, 4  ;;  %v1181_v22 = vsel %vm121_vm0, %v1161_v5, %v231_v15  ;;  %v242_v23 = vsub.f32 %v1134_v1, %v1176_v19  ;;  %v220_v27 = vrot.slane %v219_v18, 1 }
  0x34   :  { %v243_v28 = vsub.f32 %v1136_v2, %v1181_v22  ;;  %v1191_v33 = vmax.f32 %v212_v63, %v213_v17  ;;  %v110_v37 = vsel %vm109_vm1, %v1151_v24, %v102_v9  ;;  %v112_v40 = vsel %vm111_vm2, %v103_v11, %v104_v16 }
  0x35   :  { %v1189_v31 = vsel %vm121_vm0, %v1168_v13, %v232_v21  ;;  %v246_v32 = vmul.f32 1.442695, %v242_v23  ;;  %v1193_v34 = vmax.f32 %v219_v18, %v220_v27  ;;  %v116_v41 = vsel %vm115_vm3, %v105_v20, %v106_v25 }
  0x36   :  { %v244_v35 = vsub.f32 %v1138_v3, %v1189_v31  ;;  %v248_v36 = vmul.f32 1.442695, %v243_v28  ;;  %v118_v42 = vsel %vm117_vm4, %v107_v26, %v108_v29  ;;  %v114_v24 = vsel %vm113_vm5, %v110_v37, %v112_v40 }
  0x37   :  { %887 = vpow2.f32 %v246_v32  ;;  %v233_v38 = vrot.slane %v1193_v34, 4  ;;  %v120_v45 = vsel %vm119_vm6, %v116_v41, %v118_v42  ;;  %v337_v51 = vlaneseq }
  0x38   :  { %889 = vpow2.f32 %v248_v36  ;;  %v250_v39 = vmul.f32 1.442695, %v244_v35  ;;  %v122_v50 = vsel %vm121_vm0, %v114_v24, %v120_v45  ;;  %v99_v54 = vmax.f32 %v1132_v0, 0.0 }
  0x39   :  { %891 = vlog2.f32 %v130_v30  ;;  %v1205_v43 = vsel %vm121_vm0, %v1191_v33, %v233_v38  ;;  %v124_v55 = vmul.f32 %v122_v50, %v1132_v0  ;;  %v1219_v57 = vshrl.u32 %v337_v51, 7 }
  0x3a   :  { %893 = vpow2.f32 %v250_v39  ;;  %v245_v44 = vsub.f32 %v1140_v4, %v1205_v43  ;;  %v340_v58 = vperm.slane %v1212_v53, 1  ;;  %v341_v59 = vperm.slane %v1212_v53, 2 }
  0x3b   :  { %v342_v60 = vperm.slane %v1212_v53, 3  ;;  %v339_v63 = vperm.slane %v1212_v53, 0  ;;  %v343_v7 = vperm.slane %v1212_v53, 4  ;;  %v344_v8 = vperm.slane %v1212_v53, 5 }
  0x3c   :  { %v252_v47 = vmul.f32 1.442695, %v245_v44  ;;  %v345_v9 = vperm.slane %v1212_v53, 6  ;;  %v1231_v23 = vsub.f32 %v99_v54, %v124_v55  ;;  %v346_v37 = vperm.slane %v1212_v53, 7 }
  0x3d   :  { %v888_v46 = vpop.eup %887  ;;  %vm1241_vm7 = vcmp.eq.s32.totalorder %v1219_v57, %v339_v63  ;;  %vm1246_vm8 = vcmp.eq.s32.totalorder %v1219_v57, %v340_v58  ;;  %vm1251_vm9 = vcmp.eq.s32.totalorder %v1219_v57, %v341_v59  ;;  %vm1256_vm10 = vcmp.eq.s32.totalorder %v1219_v57, %v342_v60 }
  0x3e   :  { %v890_v48 = vpop.eup %889  ;;  %258 = vst [vmem:[#allocation1] ss:$2 sm:$0xff] %v888_v46  ;;  %895 = vpow2.f32 %v252_v47  ;;  %vm1266_vm11 = vcmp.eq.s32.totalorder %v1219_v57, %v343_v7  ;;  %vm1271_vm12 = vcmp.eq.s32.totalorder %v1219_v57, %v344_v8  ;;  %vm1278_vm13 = vcmp.eq.s32.totalorder %v1219_v57, %v345_v9 }
  0x3f   :  { %v892_v49 = vpop.eup %891  ;;  %260 = vst [vmem:[#allocation1 + $0x10] ss:$2 sm:$0xff] %v890_v48  ;;  %vm1283_vm14 = vcmp.eq.s32.totalorder %v1219_v57, %v346_v37  ;;  %vm504_vm15 = vcmp.lt.f32.partialorder %v1134_v1, %v1176_v19 }
  0x40   :  { %v894_v52 = vpop.eup %893  ;;  %v1216_v56 = vmul.f32 0.6931472, %v892_v49 }
  0x41   :  { %262 = vst [vmem:[#allocation1 + $0x20] ss:$2 sm:$0xff] %v894_v52 }
  0x44   :  { %v896_v10 = vpop.eup %895 }
  0x45   :  { %v265_v12 = vld.sshfl [vmem:[#allocation1] sm:$0xff pattern:$0x75316420]  ;;  %v266_v11 = vld.sshfl [vmem:[#allocation1 + $0x8] sm:$0xff pattern:$0x75316420] }
  0x46   :  { %264 = vst [vmem:[#allocation1 + $0x30] ss:$2 sm:$0xff] %v896_v10  ;;  %v267_v15 = vld.sshfl [vmem:[#allocation1 + $0x10] sm:$0xff pattern:$0x75316420]  ;;  %v281_v16 = vsel %vm121_vm0, %v265_v12, 0.0 }
  0x47   :  { %v268_v17 = vld.sshfl [vmem:[#allocation1 + $0x18] sm:$0xff pattern:$0x75316420]  ;;  %v282_v18 = vrot.slane %v281_v16, 4  ;;  %v288_v20 = vsel %vm121_vm0, %v266_v11, 0.0  ;;  %v295_v21 = vsel %vm121_vm0, %v267_v15, 0.0 }
  0x48   :  { %v269_v25 = vld.sshfl [vmem:[#allocation1 + $0x20] sm:$0xff pattern:$0x75316420]  ;;  %v270_v26 = vld.sshfl [vmem:[#allocation1 + $0x28] sm:$0xff pattern:$0x75316420] }
  0x49   :  { %v283_v27 = vadd.f32 %v282_v18, %v281_v16  ;;  %v289_v28 = vrot.slane %v288_v20, 4  ;;  %v296_v29 = vrot.slane %v295_v21, 4  ;;  %v302_v30 = vsel %vm121_vm0, %v268_v17, 0.0  ;;  %355 = vst [vmem:[#allocation1] ss:$2 sm:$0xff] %v1134_v1 }
  0x4a   :  { %v303_v32 = vrot.slane %v302_v30, 4  ;;  %v309_v35 = vsel %vm121_vm0, %v269_v25, 0.0  ;;  %v316_v36 = vsel %vm121_vm0, %v270_v26, 0.0  ;;  %357 = vst [vmem:[#allocation1 + $0x10] ss:$2 sm:$0xff] %v1136_v2 }
  0x4b   :  { %v284_v38 = vrot.slane %v283_v27, 2  ;;  %v290_v39 = vadd.f32 %v289_v28, %v288_v20  ;;  %v297_v40 = vadd.f32 %v296_v29, %v295_v21  ;;  %v310_v41 = vrot.slane %v309_v35, 4  ;;  %359 = vst [vmem:[#allocation1 + $0x20] ss:$2 sm:$0xff] %v1138_v3 }
  0x4c   :  { %v304_v42 = vadd.f32 %v303_v32, %v302_v30  ;;  %v317_v44 = vrot.slane %v316_v36, 4 }
  0x4d   :  { %v271_v46 = vld.sshfl [vmem:[#allocation1 + $0x30] sm:$0xff pattern:$0x75316420]  ;;  %v272_v47 = vld.sshfl [vmem:[#allocation1 + $0x38] sm:$0xff pattern:$0x75316420]  ;;  %v285_v48 = vadd.f32 %v284_v38, %v283_v27  ;;  %v311_v49 = vadd.f32 %v310_v41, %v309_v35 }
  0x4e   :  { %v291_v54 = vrot.slane %v290_v39, 2  ;;  %v298_v55 = vrot.slane %v297_v40, 2  ;;  %v305_v58 = vrot.slane %v304_v42, 2  ;;  %v318_v63 = vadd.f32 %v317_v44, %v316_v36  ;;  %361 = vst [vmem:[#allocation1 + $0x30] ss:$2 sm:$0xff] %v1140_v4 }
  0x4f   :  { %v286_v10 = vrot.slane %v285_v48, 1  ;;  %v312_v12 = vrot.slane %v311_v49, 2  ;;  %v323_v11 = vsel %vm121_vm0, %v271_v46, 0.0  ;;  %v330_v59 = vsel %vm121_vm0, %v272_v47, 0.0 }
  0x50   :  { %v292_v15 = vadd.f32 %v291_v54, %v290_v39  ;;  %v299_v16 = vadd.f32 %v298_v55, %v297_v40  ;;  %v306_v17 = vadd.f32 %v305_v58, %v304_v42  ;;  %v319_v18 = vrot.slane %v318_v63, 2  ;;  %v362_v26 = vld.sshfl [vmem:[#allocation1] sm:$0xff pattern:$0x75316420] }
  0x51   :  { %v1263_v60 = vadd.f32 %v312_v12, %v311_v49  ;;  %v324_v20 = vrot.slane %v323_v11, 4  ;;  %v331_v21 = vrot.slane %v330_v59, 4  ;;  %v363_v32 = vld.sshfl [vmem:[#allocation1 + $0x8] sm:$0xff pattern:$0x75316420]  ;;  %v287_v40 = vadd.f32 %v286_v10, %v285_v48 }
  0x52   :  { %v293_v27 = vrot.slane %v292_v15, 1  ;;  %v300_v28 = vrot.slane %v299_v16, 1  ;;  %v307_v29 = vrot.slane %v306_v17, 1  ;;  %v364_v39 = vld.sshfl [vmem:[#allocation1 + $0x10] sm:$0xff pattern:$0x75316420]  ;;  %v1288_v42 = vadd.f32 %v319_v18, %v318_v63 }
  0x53   :  { %v325_v35 = vadd.f32 %v324_v20, %v323_v11  ;;  %v332_v36 = vadd.f32 %v331_v21, %v330_v59  ;;  %v365_v8 = vld.sshfl [vmem:[#allocation1 + $0x18] sm:$0xff pattern:$0x75316420]  ;;  %v314_v41 = vrot.slane %v1263_v60, 1  ;;  %v378_v53 = vsel %vm1241_vm7, %v362_v26, 0.0 }
  0x54   :  { %v366_v44 = vld.sshfl [vmem:[#allocation1 + $0x20] sm:$0xff pattern:$0x75316420]  ;;  %v1292_v9 = vadd.f32 %v293_v27, %v292_v15  ;;  %v367_v49 = vld.sshfl [vmem:[#allocation1 + $0x28] sm:$0xff pattern:$0x75316420]  ;;  %v1296_v37 = vadd.f32 %v300_v28, %v299_v16  ;;  %v1298_v54 = vadd.f32 %v307_v29, %v306_v17  ;;  %vm505_vm7 = vcmp.lt.f32.partialorder %v1136_v2, %v1181_v22 }
  0x55   :  { %v326_v46 = vrot.slane %v325_v35, 2  ;;  %v333_v47 = vrot.slane %v332_v36, 2  ;;  %v379_v57 = vsel %vm1246_vm8, %v363_v32, 0.0  ;;  %v368_v48 = vld.sshfl [vmem:[#allocation1 + $0x30] sm:$0xff pattern:$0x75316420]  ;;  %897 = vlog2.f32 %v287_v40 }
  0x56   :  { %v369_v55 = vld.sshfl [vmem:[#allocation1 + $0x38] sm:$0xff pattern:$0x75316420]  ;;  %v380_v63 = vsel %vm1251_vm9, %v364_v39, 0.0  ;;  %v381_v45 = vsel %vm1256_vm10, %v365_v8, 0.0  ;;  %v321_v10 = vrot.slane %v1288_v42, 1  ;;  %899 = vlog2.f32 %v1292_v9 }
  0x57   :  { %v327_v24 = vadd.f32 %v326_v46, %v325_v35  ;;  %v334_v58 = vadd.f32 %v333_v47, %v332_v36  ;;  %v382_v12 = vsel %vm1266_vm11, %v366_v44, 0.0  ;;  %v383_v11 = vsel %vm1271_vm12, %v367_v49, 0.0 }
  0x58   :  { %v384_v59 = vsel %vm1278_vm13, %v368_v48, 0.0  ;;  %v385_v15 = vsel %vm1283_vm14, %v369_v55, 0.0  ;;  %v386_v50 = vsel %vm121_vm0, %v378_v53, 0.0  ;;  %v393_v52 = vsel %vm121_vm0, %v379_v57, 0.0 }
  0x59   :  { %v387_v16 = vrot.slane %v386_v50, 4  ;;  %v394_v17 = vrot.slane %v393_v52, 4  ;;  %v400_v18 = vsel %vm121_vm0, %v380_v63, 0.0  ;;  %v407_v20 = vsel %vm121_vm0, %v381_v45, 0.0 }
  0x5a   :  { %v328_v21 = vrot.slane %v327_v24, 1  ;;  %v335_v25 = vrot.slane %v334_v58, 1  ;;  %v401_v26 = vrot.slane %v400_v18, 4  ;;  %v408_v27 = vrot.slane %v407_v20, 4 }
  0x5b   :  { %v388_v28 = vadd.f32 %v387_v16, %v386_v50  ;;  %v395_v29 = vadd.f32 %v394_v17, %v393_v52  ;;  %v414_v30 = vsel %vm121_vm0, %v382_v12, 0.0  ;;  %v421_v32 = vsel %vm121_vm0, %v383_v11, 0.0  ;;  %v898_v39 = vpop.eup %897 }
  0x5c   :  { %v402_v35 = vadd.f32 %v401_v26, %v400_v18  ;;  %v409_v36 = vadd.f32 %v408_v27, %v407_v20  ;;  %v415_v7 = vrot.slane %v414_v30, 4  ;;  %v422_v38 = vrot.slane %v421_v32, 4 }
  0x5d   :  { %v389_v8 = vrot.slane %v388_v28, 2  ;;  %v396_v40 = vrot.slane %v395_v29, 2  ;;  %v428_v44 = vsel %vm121_vm0, %v384_v59, 0.0  ;;  %v435_v53 = vsel %vm121_vm0, %v385_v15, 0.0 }
  0x5e   :  { %v403_v46 = vrot.slane %v402_v35, 2  ;;  %v410_v47 = vrot.slane %v409_v36, 2  ;;  %v416_v49 = vadd.f32 %v415_v7, %v414_v30  ;;  %v423_v57 = vadd.f32 %v422_v38, %v421_v32 }
  0x5f   :  { %v390_v48 = vadd.f32 %v389_v8, %v388_v28  ;;  %v397_v55 = vadd.f32 %v396_v40, %v395_v29  ;;  %v429_v63 = vrot.slane %v428_v44, 4  ;;  %v436_v45 = vrot.slane %v435_v53, 4 }
  0x60   :  { %v404_v12 = vadd.f32 %v403_v46, %v402_v35  ;;  %v411_v11 = vadd.f32 %v410_v47, %v409_v36  ;;  %v417_v50 = vrot.slane %v416_v49, 2  ;;  %v424_v52 = vrot.slane %v423_v57, 2 }
  0x61   :  { %v315_v16 = vadd.f32 %v314_v41, %v1263_v60  ;;  %v391_v17 = vrot.slane %v390_v48, 1  ;;  %v430_v18 = vadd.f32 %v429_v63, %v428_v44  ;;  %v437_v20 = vadd.f32 %v436_v45, %v435_v53 }
  0x62   :  { %v398_v59 = vrot.slane %v397_v55, 1  ;;  %v405_v26 = vrot.slane %v404_v12, 1  ;;  %v418_v15 = vadd.f32 %v417_v50, %v416_v49  ;;  %v425_v27 = vadd.f32 %v424_v52, %v423_v57 }
  0x63   :  { %v322_v30 = vadd.f32 %v321_v10, %v1288_v42  ;;  %v329_v32 = vadd.f32 %v328_v21, %v327_v24  ;;  %v431_v28 = vrot.slane %v430_v18, 2  ;;  %v438_v29 = vrot.slane %v437_v20, 2 }
  0x64   :  { %v336_v7 = vadd.f32 %v335_v25, %v334_v58  ;;  %v412_v38 = vrot.slane %v411_v11, 1  ;;  %v419_v35 = vrot.slane %v418_v15, 1  ;;  %v426_v36 = vrot.slane %v425_v27, 1  ;;  %v1338_v58 = vld [vmem:[%s1401_s2] sm:$0xff] }
  0x65   :  { %v432_v8 = vadd.f32 %v431_v28, %v430_v18  ;;  %v439_v40 = vadd.f32 %v438_v29, %v437_v20  ;;  %v443_v46 = vmul.f32 0.6931472, %v898_v39  ;;  %v1328_v60 = vadd.f32 %v391_v17, %v390_v48 }
  0x66   :  { %v399_v41 = vadd.f32 %v398_v59, %v397_v55  ;;  %v406_v44 = vadd.f32 %v405_v26, %v404_v12  ;;  %901 = vlog2.f32 %v1296_v37  ;;  %v413_v10 = vadd.f32 %v412_v38, %v411_v11 }
  0x67   :  { %v433_v53 = vrot.slane %v432_v8, 1  ;;  %v440_v42 = vrot.slane %v439_v40, 1  ;;  %903 = vlog2.f32 %v1298_v54  ;;  %v1333_v24 = vadd.f32 %v443_v46, %v1157_v61  ;;  %v900_v54 = vpop.eup %899 }
  0x68   :  { %v420_v9 = vadd.f32 %v419_v35, %v418_v15  ;;  %905 = vlog2.f32 %v315_v16  ;;  %vm506_vm8 = vcmp.lt.f32.partialorder %v1138_v3, %v1189_v31  ;;  %v427_v21 = vadd.f32 %v426_v36, %v425_v27 }
  0x69   :  { %v1342_v37 = vadd.f32 %v433_v53, %v432_v8  ;;  %v1344_v25 = vadd.f32 %v440_v42, %v439_v40  ;;  %907 = vlog2.f32 %v322_v30  ;;  %v466_v61 = vsub.f32 %v1333_v24, %v1328_v60 }
  0x6a   :  { %909 = vlog2.f32 %v329_v32  ;;  %vm498_vm9 = vcmp.gt.f32.partialorder %v1132_v0, 0.0  ;;  %vm500_vm10 = vcmp.gt.f32.partialorder %v1338_v58, 0.0  ;;  %vm507_vm11 = vcmp.lt.f32.partialorder %v1140_v4, %v1205_v43 }
  0x6b   :  { %911 = vlog2.f32 %v336_v7  ;;  %v1074_v3 = vmov 0   ;;  %v445_v57 = vmul.f32 0.6931472, %v900_v54  ;;  %vm501_vm12 = vmxor %vm498_vm9, %vm500_vm10  ;;  %v1075_v54 = vmov 0.0  }
  0x6c   :  { %v508_v31 = vsel %vm504_vm15, 1, %v1074_v3  ;;  %v509_v39 = vsel %vm505_vm7, 1, %v1074_v3  ;;  %v510_v47 = vsel %vm506_vm8, 1, %v1074_v3  ;;  %v902_v49 = vpop.eup %901  ;;  %v511_v48 = vsel %vm507_vm11, 1, %v1074_v3 }
  0x6d   :  { %v512_v55 = vrot.slane %v508_v31, 3  ;;  %v513_v63 = vrot.slane %v509_v39, 6  ;;  %v904_v45 = vpop.eup %903  ;;  %v447_v12 = vmul.f32 0.6931472, %v902_v49  ;;  %v514_v4 = vrot.slane %v509_v39, 1 }
  0x6e   :  { %v515_v43 = vrot.slane %v510_v47, 4  ;;  %v516_v11 = vrot.slane %v510_v47, 7  ;;  %v906_v50 = vpop.eup %905  ;;  %v449_v52 = vmul.f32 0.6931472, %v904_v45  ;;  %v459_v1 = vadd.f32 %v445_v57, %v1159_v62 }
  0x6f   :  { %v517_v19 = vrot.slane %v511_v48, 2  ;;  %v518_v16 = vrot.slane %v511_v48, 5  ;;  %v908_v17 = vpop.eup %907  ;;  %v451_v2 = vmul.f32 0.6931472, %v906_v50  ;;  %v460_v22 = vadd.f32 %v447_v12, %v1161_v5 }
  0x70   :  { %v519_v18 = vsel %vm109_vm1, %v508_v31, %v512_v55  ;;  %v520_v20 = vsel %vm111_vm2, %v513_v63, %v514_v4  ;;  %v910_v59 = vpop.eup %909  ;;  %v453_v26 = vmul.f32 0.6931472, %v908_v17  ;;  %v461_v15 = vadd.f32 %v449_v52, %v1163_v6 }
  0x71   :  { %v467_v27 = vsub.f32 %v459_v1, %v399_v41  ;;  %v521_v30 = vsel %vm113_vm5, %v519_v18, %v520_v20  ;;  %v912_v32 = vpop.eup %911  ;;  %v455_v28 = vmul.f32 0.6931472, %v910_v59  ;;  %v462_v62 = vadd.f32 %v451_v2, %v1168_v13 }
  0x72   :  { %v468_v29 = vsub.f32 %v460_v22, %v406_v44  ;;  %v522_v7 = vsel %vm115_vm3, %v515_v43, %v516_v11  ;;  %v457_v38 = vmul.f32 0.6931472, %v912_v32  ;;  %v463_v5 = vadd.f32 %v453_v26, %v1170_v14 }
  0x73   :  { %v469_v35 = vsub.f32 %v461_v15, %v413_v10  ;;  %v482_v36 = vrot.slane %v467_v27, 7  ;;  %v464_v8 = vadd.f32 %v455_v28, %v1191_v33  ;;  %v470_v40 = vsub.f32 %v462_v62, %v420_v9  ;;  %v533_v9 = vld [vmem:[#allocation10] sm:$0x1f] }
  0x74   :  { %v483_v46 = vrot.slane %v468_v29, 6  ;;  %v523_v6 = vsel %vm117_vm4, %v517_v19, %v518_v16  ;;  %v465_v60 = vadd.f32 %v457_v38, %v1193_v34  ;;  %v471_v41 = vsub.f32 %v463_v5, %v427_v21 }
  0x75   :  { %v484_v53 = vrot.slane %v469_v35, 5  ;;  %v489_v13 = vsel %vm109_vm1, %v466_v61, %v482_v36  ;;  %v472_v44 = vsub.f32 %v464_v8, %v1342_v37  ;;  %v485_v42 = vrot.slane %v470_v40, 4 }
  0x76   :  { %v524_v14 = vsel %vm119_vm6, %v522_v7, %v523_v6  ;;  %v473_v33 = vsub.f32 %v465_v60, %v1344_v25  ;;  %v486_v24 = vrot.slane %v471_v41, 3  ;;  %v871_v3 = vsel %vm501_vm12, 1.0, %v1075_v54 }
  0x77   :  { %v490_v10 = vsel %vm111_vm2, %v483_v46, %v484_v53  ;;  %v525_v34 = vsel %vm121_vm0, %v521_v30, %v524_v14  ;;  %v487_v21 = vrot.slane %v472_v44, 2  ;;  %v133_v25 = vadd.f32 %v1216_v56, %v1231_v23  ;;  %v541_v56 = vld [vmem:[%s1405_s6] sm:$0x7] }
  0x78   :  { %v491_v61 = vsel %vm113_vm5, %v489_v13, %v490_v10  ;;  %vm526_vm13 = vcmp.ne.s32.totalorder %v525_v34, 0  ;;  %v488_v37 = vrot.slane %v473_v33, 1  ;;  %v492_v58 = vsel %vm115_vm3, %v485_v42, %v486_v24 }
  0x79   :  { %vm527_vm14 = vmxor %vm498_vm9, %vm526_vm13  ;;  %v577_v39 = vand.u32 2147483647, %v533_v9  ;;  %v642_v12 = vand.u32 127, %v337_v51  ;;  %v545_v50 = vunpack.c.l.bf16 %v541_v56  ;;  %v553_v19 = vmax.f32 %v533_v9, 0.0 }
  0x7a   :  { %v872_v31 = vsel %vm527_vm14, 1.0, %v1075_v54  ;;  %v493_v47 = vsel %vm117_vm4, %v487_v21, %v488_v37 }
  0x7b   :  { %v494_v49 = vsel %vm119_vm6, %v492_v58, %v493_v47  ;;  %v530_v57 = vadd.f32 %v872_v31, %v871_v3  ;;  %v585_v48 = vsub.f32 0.0, %v577_v39  ;;  %vm740_vm2 = vcmp.lt.s32.totalorder %v642_v12, 8 }
  0x7c   :  { %v495_v55 = vsel %vm121_vm0, %v491_v61, %v494_v49  ;;  %v561_v51 = vmul.f32 %v545_v50, %v533_v9  ;;  %vm821_vm0 = vcmask 1044480  }
  0x7d   :  { %v497_v63 = vadd.f32 %v495_v55, %v133_v25  ;;  %v593_v45 = vmul.f32 1.442695, %v585_v48 }
  0x7e   :  { %v569_v16 = vsub.f32 %v553_v19, %v561_v51 }
  0x7f   :  { %v531_v4 = vadd.f32 %v530_v57, %v497_v63  ;;  %913 = vpow2.f32 %v593_v45 }
  0x81   :  { %v532_v0 = vmul.f32 0.125, %v531_v4 }
  0x83   :  { %v749_v23 = vperm.slane %v532_v0, 0 }
  0x85   :  { %v914_v43 = vpop.eup %913  ;;  %v765_v11 = vsel %vm740_vm2, %v749_v23, 0.0 }
  0x86   :  { %v797_v52 = vsel %vm109_vm1, %v765_v11, 0.0  ;;  %v609_v1 = vadd.f32 1.0, %v914_v43  ;;  %vm848_vm1 = vcmp.eq.s32.totalorder %v642_v12, 0 }
  0x87   :  { %812 = vadd.xlane.f32.xlu0 %v797_v52 }
  0x88   :  { %915 = vlog2.f32 %v609_v1 }
  0x8e   :  { %v916_v17 = vpop.eup %915 }
  0x8f   :  { %v618_v2 = vmul.f32 0.6931472, %v916_v17 }
  0x91   :  { %v633_v22 = vadd.f32 %v618_v2, %v569_v16 }
  0x93   :  { %v789_v18 = vsel %vm740_vm2, %v633_v22, 0.0 }
  0x94   :  { %v822_v20 = vsel %vm821_vm0, %v789_v18, 0.0 }
  0x95   :  { %837 = vadd.xlane.f32.xlu0 %v822_v20 }
  0xfa   :  { %v813_v59 = vpop.xlane.xlu0 %812 }
  0xfb   :  { %v814_v26 = vrot.slane %v813_v59, 4 }
  0xfd   :  { %v815_v15 = vadd.f32 %v814_v26, %v813_v59 }
  0xff   :  { %v816_v27 = vrot.slane %v815_v15, 2 }
 0x101   :  { %v817_v30 = vadd.f32 %v816_v27, %v815_v15 }
 0x103   :  { %v818_v32 = vrot.slane %v817_v30, 1 }
 0x105   :  { %v819_v28 = vadd.f32 %v818_v32, %v817_v30 }
 0x107   :  { %873 = vpush %v819_v28 }
 0x108   :  { %v838_v62 = vpop.xlane.xlu0 %837 }
 0x109   :  { %v839_v29 = vrot.slane %v838_v62, 4 }
 0x10b   :  { %v840_v7 = vadd.f32 %v839_v29, %v838_v62 }
 0x10d   :  { %v841_v38 = vrot.slane %v840_v7, 2 }
 0x10f   :  { %v842_v5 = vadd.f32 %v841_v38, %v840_v7 }
 0x111   :  { %v843_v35 = vrot.slane %v842_v5, 1 }
 0x113   :  { %v844_v36 = vadd.f32 %v843_v35, %v842_v5 }
 0x115   :  { %875 = vpush %v844_v36 }
 0x138   :  { %s874_s6 = spop %873 }
 0x146   :  { %s876_s24 = spop %875 }
 0x147   :  { %s846_s25 = smul.f32 0.025, %s876_s24 }
 0x149   :  { %s847_s8 = sadd.f32 %s874_s6, %s846_s25 }
 0x14b   :  { %v849_v8 = vstv %s847_s8 }
 0x14c   :  { %v850_v40 = vsel %vm848_vm1, %v849_v8, 0.0 }
 0x14d   :  { %851 = vst [vmem:[#allocation11] sm:$0x1] %v850_v40 }
 0x14e   :  { %862 = dma.vmem_to_hbm [thread:$0]  %s858_s27, 16, %s860_s30, [#allocation4]  }
 0x14f   :  { %1067 = dma.done.wait [#allocation4], 16  }
 0x150   :  { %1068 = vsyncadd [#allocation4], 4294967280 }
 0x151   :  { %867 = vsyncpa [#allocation3], 1 }
 0x152   :  { %868 = vsyncpa [#allocation6], 1 }
 0x153   :  { %869 = vsyncpa [#allocation9], 1 }
 0x154   :  { %870 = vsyncpa [#allocation4], 1 }

</bundles_post_ra>
